<compile_context>
chip_gen: v5e
topology: v5e:2x2
jax: 0.10.0
libtpu: 0.0.40
codegen_flags: <defaults>
</compile_context>

<pallas_src>
import jax
import jax.numpy as jnp
from jax.experimental import pallas as pl
from jax.experimental.pallas import tpu as pltpu

_LANE = 128


def pack_params(params, hidden_dim, n_classes):
    """Pack all Linear weights/biases into one zero-padded f32 slab.  Call ONCE at init.

    Slab layout (lane width W = 128 * ceil(max(H, n_classes)/128); every block starts at
    an 8-row-aligned offset so in-kernel slices never cross (8,128) tile boundaries;
    padded entries are zero):
      rows [ 0,  4): w1 [4, H]   (in-dim 4 = [mean_comp, mean_port0, mean_port1, mean_net])
      rows [ 8,  9): b1 [1, H]
      rows [16, 16+W): w2 [H, H]   (in-dim zero-padded to W rows)
      rows [16+W, 17+W): b2 [1, H]
      rows [24+W, 24+2W): w3 [H, C] (in-dim zero-padded to W rows)
      rows [24+2W, 25+2W): b3 [1, C]
    """
    w1, b1, w2, b2, w3, b3 = params
    H = hidden_dim
    W = _LANE * max(pl.cdiv(H, _LANE), pl.cdiv(n_classes, _LANE))
    slab = jnp.zeros((32 + 2 * W, W), jnp.float32)
    slab = slab.at[0:4, :H].set(w1)
    slab = slab.at[8:9, :H].set(b1)
    slab = slab.at[16:16 + H, :H].set(w2)
    slab = slab.at[16 + W:17 + W, :H].set(b2)
    slab = slab.at[24 + W:24 + W + H, :n_classes].set(w3)
    slab = slab.at[24 + 2 * W:25 + 2 * W, :n_classes].set(b3)
    return slab


def classifier_kernel(comp_ref, port_ref, net_ref, slab_ref, out_ref):
    W = slab_ref.shape[1]            # lane-padded hidden / class width (static)
    off_b2 = 16 + W
    off_w3 = 24 + W
    off_b3 = 24 + 2 * W

    # Compile-time reciprocals of the (static, uniform) per-graph node counts.
    # TODO(synk): per-graph counts via scalar prefetch for padded variable-size batches.
    inv_nc = 1.0 / comp_ref.shape[1]
    inv_np = 1.0 / port_ref.shape[1]
    inv_nn = 1.0 / net_ref.shape[1]

    # --- dgl.mean_nodes per node type: sublane (node-axis) sums * 1/N ---
    mc = jnp.sum(comp_ref[...], axis=1) * inv_nc        # [B, 1]
    ps = jnp.sum(port_ref[...], axis=1) * inv_np        # [B, 2]
    mn = jnp.sum(net_ref[...], axis=1) * inv_nn         # [B, 1]

    # --- classify MLP ---
    # Layer 1 (in-dim 4): fused rank-1 VPU sum; avoids building a [B, 4] lane concat.
    h = (mc * slab_ref[0:1, :] + ps[:, 0:1] * slab_ref[1:2, :]
         + ps[:, 1:2] * slab_ref[2:3, :] + mn * slab_ref[3:4, :]
         + slab_ref[8:9, :])                             # [B, W]
    h = jnp.maximum(h, 0.0)                              # padded lanes stay exactly 0

    # Layer 2: one MXU matmul; zero-padded rows/cols keep padded lanes exactly 0.
    h = jnp.dot(h, slab_ref[16:16 + W, :], preferred_element_type=jnp.float32)
    h = jnp.maximum(h + slab_ref[off_b2:off_b2 + 1, :], 0.0)

    # Layer 3: output lanes >= n_classes are exactly 0; full-width unmasked store.
    out = jnp.dot(h, slab_ref[off_w3:off_w3 + W, :], preferred_element_type=jnp.float32)
    out_ref[...] = out + slab_ref[off_b3:off_b3 + 1, :]


def classifier_hetero_forward(comp_h, port_h, net_h, slab, n_classes):
    """comp_h: [B,Nc,1], port_h: [B,Np,2], net_h: [B,Nn,1], slab: from pack_params.

    Returns logits [B, n_classes].  B should ideally be a multiple of 8 so all vreg
    sublanes and the output store are fully utilized.
    """
    B = comp_h.shape[0]
    W = slab.shape[1]
    vmem = pl.BlockSpec(memory_space=pltpu.MemorySpace.VMEM)
    out = pl.pallas_call(
        classifier_kernel,
        out_shape=jax.ShapeDtypeStruct((B, W), jnp.float32),
        in_specs=[vmem, vmem, vmem, vmem],
        out_specs=vmem,
    )(comp_h, port_h, net_h, slab)
    # TODO(synk): drop this slice if the consumer tolerates 128-wide zero-padded logits.
    return out[:, :n_classes]


def reference_forward(comp_h, port_h, net_h, params):
    """Pure-JAX reference mirroring the PyTorch module's observable output."""
    w1, b1, w2, b2, w3, b3 = params
    hg = jnp.concatenate([comp_h.mean(axis=1), port_h.mean(axis=1),
                          net_h.mean(axis=1)], axis=1)               # [B, 4]
    hp = jax.lax.Precision.HIGHEST
    h = jax.nn.relu(jnp.dot(hg, w1, precision=hp) + b1)
    h = jax.nn.relu(jnp.dot(h, w2, precision=hp) + b2)
    return jnp.dot(h, w3, precision=hp) + b3


def init_params(key, hidden_dim, n_classes):
    """Deterministic init matching nn.Linear shapes (weights stored [in, out])."""
    def linear(k, fan_in, fan_out):
        kw, kb = jax.random.split(k)
        bound = 1.0 / jnp.sqrt(jnp.float32(fan_in))
        w = jax.random.uniform(kw, (fan_in, fan_out), jnp.float32, -bound, bound)
        b = jax.random.uniform(kb, (1, fan_out), jnp.float32, -bound, bound)
        return w, b

    k1, k2, k3 = jax.random.split(key, 3)
    w1, b1 = linear(k1, 4, hidden_dim)
    w2, b2 = linear(k2, hidden_dim, hidden_dim)
    w3, b3 = linear(k3, hidden_dim, n_classes)
    return (w1, b1, w2, b2, w3, b3)


if __name__ == "__main__":
    # 8 graphs per call (fills all 8 vreg sublanes); 8 components, 16 ports, 8 nets each.
    B, Nc, Np, Nn = 8, 8, 16, 8
    hidden_dim, n_classes = 32, 3

    key = jax.random.PRNGKey(0)
    k_c, k_p, k_n, k_w = jax.random.split(key, 4)
    comp_h = jax.random.normal(k_c, (B, Nc, 1), jnp.float32)
    port_h = jax.random.normal(k_p, (B, Np, 2), jnp.float32)
    net_h = jax.random.normal(k_n, (B, Nn, 1), jnp.float32)

    params = init_params(k_w, hidden_dim, n_classes)
    slab = pack_params(params, hidden_dim, n_classes)   # packed / padded ONCE at init
    slab = jax.block_until_ready(slab)

    out = classifier_hetero_forward(comp_h, port_h, net_h, slab, n_classes)
    out = jax.block_until_ready(out)

    ref = reference_forward(comp_h, port_h, net_h, params)
    assert out.shape == (B, n_classes)
    assert jnp.allclose(out, ref, atol=2e-3, rtol=2e-3), (out, ref)

    print("KERNEL_OK")
</pallas_src>

<mosaic_0001>
module attributes {stable_mosaic.version = 11 : i64} {
  func.func @classifier_kernel(%arg0: memref<8x8x1xf32, #tpu.memory_space<vmem>>, %arg1: memref<8x16x2xf32, #tpu.memory_space<vmem>>, %arg2: memref<8x8x1xf32, #tpu.memory_space<vmem>>, %arg3: memref<288x128xf32, #tpu.memory_space<vmem>>, %arg4: memref<8x128xf32, #tpu.memory_space<vmem>>) attributes {dimension_semantics = [], scalar_prefetch = 0 : i64, scratch_operands = 0 : i64, tpu.core_type = #tpu.core_type<tc>} {
    %c0 = arith.constant 0 : index
    %c0_0 = arith.constant 0 : index
    %c0_1 = arith.constant 0 : index
    %0 = vector.load %arg0[%c0, %c0_0, %c0_1] : memref<8x8x1xf32, #tpu.memory_space<vmem>>, vector<8x8x1xf32>
    %cst = arith.constant dense<0.000000e+00> : vector<8x1xf32>
    %1 = vector.multi_reduction <add>, %0, %cst [1] : vector<8x8x1xf32> to vector<8x1xf32>
    %cst_2 = arith.constant 1.250000e-01 : f32
    %2 = vector.broadcast %cst_2 : f32 to vector<8x1xf32>
    %3 = arith.mulf %1, %2 : vector<8x1xf32>
    %c0_3 = arith.constant 0 : index
    %c0_4 = arith.constant 0 : index
    %c0_5 = arith.constant 0 : index
    %4 = vector.load %arg1[%c0_3, %c0_4, %c0_5] : memref<8x16x2xf32, #tpu.memory_space<vmem>>, vector<8x16x2xf32>
    %cst_6 = arith.constant dense<0.000000e+00> : vector<8x2xf32>
    %5 = vector.multi_reduction <add>, %4, %cst_6 [1] : vector<8x16x2xf32> to vector<8x2xf32>
    %cst_7 = arith.constant 6.250000e-02 : f32
    %6 = vector.broadcast %cst_7 : f32 to vector<8x2xf32>
    %7 = arith.mulf %5, %6 : vector<8x2xf32>
    %c0_8 = arith.constant 0 : index
    %c0_9 = arith.constant 0 : index
    %c0_10 = arith.constant 0 : index
    %8 = vector.load %arg2[%c0_8, %c0_9, %c0_10] : memref<8x8x1xf32, #tpu.memory_space<vmem>>, vector<8x8x1xf32>
    %cst_11 = arith.constant dense<0.000000e+00> : vector<8x1xf32>
    %9 = vector.multi_reduction <add>, %8, %cst_11 [1] : vector<8x8x1xf32> to vector<8x1xf32>
    %cst_12 = arith.constant 1.250000e-01 : f32
    %10 = vector.broadcast %cst_12 : f32 to vector<8x1xf32>
    %11 = arith.mulf %9, %10 : vector<8x1xf32>
    %c0_13 = arith.constant 0 : index
    %c0_14 = arith.constant 0 : index
    %12 = vector.load %arg3[%c0_13, %c0_14] : memref<288x128xf32, #tpu.memory_space<vmem>>, vector<1x128xf32>
    %13 = vector.broadcast %3 : vector<8x1xf32> to vector<8x128xf32>
    %14 = vector.broadcast %12 : vector<1x128xf32> to vector<8x128xf32>
    %15 = arith.mulf %13, %14 : vector<8x128xf32>
    %16 = vector.extract_strided_slice %7 {offsets = [0, 0], sizes = [8, 1], strides = [1, 1]} : vector<8x2xf32> to vector<8x1xf32>
    %c1 = arith.constant 1 : index
    %c0_15 = arith.constant 0 : index
    %17 = vector.load %arg3[%c1, %c0_15] : memref<288x128xf32, #tpu.memory_space<vmem>>, vector<1x128xf32>
    %18 = vector.broadcast %16 : vector<8x1xf32> to vector<8x128xf32>
    %19 = vector.broadcast %17 : vector<1x128xf32> to vector<8x128xf32>
    %20 = arith.mulf %18, %19 : vector<8x128xf32>
    %21 = arith.addf %15, %20 : vector<8x128xf32>
    %22 = vector.extract_strided_slice %7 {offsets = [0, 1], sizes = [8, 1], strides = [1, 1]} : vector<8x2xf32> to vector<8x1xf32>
    %c2 = arith.constant 2 : index
    %c0_16 = arith.constant 0 : index
    %23 = vector.load %arg3[%c2, %c0_16] : memref<288x128xf32, #tpu.memory_space<vmem>>, vector<1x128xf32>
    %24 = vector.broadcast %22 : vector<8x1xf32> to vector<8x128xf32>
    %25 = vector.broadcast %23 : vector<1x128xf32> to vector<8x128xf32>
    %26 = arith.mulf %24, %25 : vector<8x128xf32>
    %27 = arith.addf %21, %26 : vector<8x128xf32>
    %c3 = arith.constant 3 : index
    %c0_17 = arith.constant 0 : index
    %28 = vector.load %arg3[%c3, %c0_17] : memref<288x128xf32, #tpu.memory_space<vmem>>, vector<1x128xf32>
    %29 = vector.broadcast %11 : vector<8x1xf32> to vector<8x128xf32>
    %30 = vector.broadcast %28 : vector<1x128xf32> to vector<8x128xf32>
    %31 = arith.mulf %29, %30 : vector<8x128xf32>
    %32 = arith.addf %27, %31 : vector<8x128xf32>
    %c8 = arith.constant 8 : index
    %c0_18 = arith.constant 0 : index
    %33 = vector.load %arg3[%c8, %c0_18] : memref<288x128xf32, #tpu.memory_space<vmem>>, vector<1x128xf32>
    %34 = vector.broadcast %33 : vector<1x128xf32> to vector<8x128xf32>
    %35 = arith.addf %32, %34 : vector<8x128xf32>
    %cst_19 = arith.constant 0.000000e+00 : f32
    %36 = vector.broadcast %cst_19 : f32 to vector<8x128xf32>
    %37 = arith.maximumf %35, %36 : vector<8x128xf32>
    %c16 = arith.constant 16 : index
    %c0_20 = arith.constant 0 : index
    %38 = vector.load %arg3[%c16, %c0_20] : memref<288x128xf32, #tpu.memory_space<vmem>>, vector<128x128xf32>
    %cst_21 = arith.constant dense<0.000000e+00> : vector<8x128xf32>
    %39 = tpu.matmul %37, %38, %cst_21 {dimension_numbers = #tpu.dot_dimension_numbers<[1], [0], [0], [1], [0, 0, 1, 1], [], []>} : vector<8x128xf32>, vector<128x128xf32>, vector<8x128xf32> -> vector<8x128xf32>
    %c144 = arith.constant 144 : index
    %c0_22 = arith.constant 0 : index
    %40 = vector.load %arg3[%c144, %c0_22] : memref<288x128xf32, #tpu.memory_space<vmem>>, vector<1x128xf32>
    %41 = vector.broadcast %40 : vector<1x128xf32> to vector<8x128xf32>
    %42 = arith.addf %39, %41 : vector<8x128xf32>
    %cst_23 = arith.constant 0.000000e+00 : f32
    %43 = vector.broadcast %cst_23 : f32 to vector<8x128xf32>
    %44 = arith.maximumf %42, %43 : vector<8x128xf32>
    %c152 = arith.constant 152 : index
    %c0_24 = arith.constant 0 : index
    %45 = vector.load %arg3[%c152, %c0_24] : memref<288x128xf32, #tpu.memory_space<vmem>>, vector<128x128xf32>
    %cst_25 = arith.constant dense<0.000000e+00> : vector<8x128xf32>
    %46 = tpu.matmul %44, %45, %cst_25 {dimension_numbers = #tpu.dot_dimension_numbers<[1], [0], [0], [1], [0, 0, 1, 1], [], []>} : vector<8x128xf32>, vector<128x128xf32>, vector<8x128xf32> -> vector<8x128xf32>
    %c280 = arith.constant 280 : index
    %c0_26 = arith.constant 0 : index
    %47 = vector.load %arg3[%c280, %c0_26] : memref<288x128xf32, #tpu.memory_space<vmem>>, vector<1x128xf32>
    %48 = vector.broadcast %47 : vector<1x128xf32> to vector<8x128xf32>
    %49 = arith.addf %46, %48 : vector<8x128xf32>
    %c0_27 = arith.constant 0 : index
    %c0_28 = arith.constant 0 : index
    %50 = vector.load %arg4[%c0_27, %c0_28] : memref<8x128xf32, #tpu.memory_space<vmem>>, vector<8x128xf32>
    tpu.vector_store %arg4[%c0_27, %c0_28], %49 {strides = array<i32>} : memref<8x128xf32, #tpu.memory_space<vmem>>, vector<8x128xf32>,
    return
  }
}

</mosaic_0001>

<bundles_post_ra>
// kernel: tpu_custom_call.1
= control target key start
LH: loop header
LB: loop body
LE: loop exit
PB: predicated region body
PF: predicated region fallthrough
CT: control target
= control target key end

     0   :  { %9 = vsyncpa [#allocation3], 0  ;;  %s983_s0 = inlined_call_operand.vmem [shape: f32[8,8,1], index: 0, kind: input, shape index: {}]   ;;  %s984_s1 = inlined_call_operand.vmem [shape: f32[8,16,2], index: 1, kind: input, shape index: {}]   ;;  %s985_s2 = inlined_call_operand.vmem [shape: f32[8,8,1], index: 2, kind: input, shape index: {}]   ;;  %s986_s3 = inlined_call_operand.hbm [shape: f32[288,128], index: 3, kind: input, shape index: {}]   ;;  %s987_s4 = inlined_call_operand.hbm [shape: f32[8,128], index: 4, kind: output, shape index: {}]  }
   0x1   :  { %10 = vsyncpa [#allocation4], 0  ;;  %s21_s17 = sshll.u32 %s986_s3, 4  ;;  %s711_s18 = smov [#allocation2]   ;;  %s22_s17 = int_to_ptr.hbm [resolvable:$true] %s21_s17 }
   0x2   :  { %s23_s19 = sshll.u32 %s711_s18, 4  ;;  %s712_s20 = smov 128   ;;  %s24_s19 = int_to_ptr.vmem [resolvable:$true] %s23_s19 }
   0x3   :  { %s713_s21 = smov 8  }
   0x4   :  { %29 = dma.hbm_to_vmem [thread:$0]  %s22_s17, 4608, %s24_s19, [#allocation3], %s712_s20, %s712_s20, %s713_s21  }
   0x5   :  { %707 = dma.done.wait [#allocation3], 4608  }
   0x6   :  { %708 = vsyncadd [#allocation3], 4294962688  ;;  %v714_v0 = vmov 0   ;;  %vm42_vm0 = vcmask 7168   ;;  %vm123_vm1 = vcmask 15360   ;;  %v36_v1 = vld [vmem:[%s983_s0 + $0x10] sm:$0xff] }
   0x7   :  { %643 = vset.pattern.permute.xlu2 %v714_v0  ;;  %642 = vset.pattern.permute.xlu1 %v714_v0  ;;  %v35_v2 = vld [vmem:[%s983_s0 + $0x8] sm:$0xff]  ;;  %v34_v3 = vld [vmem:[%s983_s0] sm:$0xff]  ;;  %v57_v4 = vsel %vm42_vm0, %v36_v1, 0.0  ;;  %v37_v14 = vld [vmem:[%s983_s0 + $0x18] sm:$0xff]  ;;  %vm537_vm2 = vcmask 1041409   ;;  %vm540_vm3 = vcmask 1042434  }
   0x8   :  { %641 = vset.pattern.permute.xlu0 %v714_v0  ;;  %v50_v5 = vsel %vm42_vm0, %v35_v2, 0.0  ;;  %v43_v6 = vsel %vm42_vm0, %v34_v3, 0.0  ;;  %v111_v7 = vld [vmem:[%s984_s1 + $0x20] sm:$0xff]  ;;  %v112_v8 = vld [vmem:[%s984_s1 + $0x28] sm:$0xff]  ;;  %v58_v10 = vrot.slane %v57_v4, 4  ;;  %v113_v15 = vld [vmem:[%s984_s1 + $0x30] sm:$0xff] }
   0x9   :  { %v38_v9 = vld [vmem:[%s983_s0 + $0x20] sm:$0xff]  ;;  %v51_v11 = vrot.slane %v50_v5, 4  ;;  %v44_v12 = vrot.slane %v43_v6, 4  ;;  %v142_v13 = vsel %vm123_vm1, %v111_v7, 0.0  ;;  %v143_v16 = vsel %vm123_vm1, %v112_v8, 0.0  ;;  %v114_v19 = vld [vmem:[%s984_s1 + $0x38] sm:$0xff] }
   0xa   :  { %v71_v17 = vsel %vm42_vm0, %v38_v9, 0.0  ;;  %v64_v18 = vsel %vm42_vm0, %v37_v14, 0.0  ;;  %v151_v20 = vsel %vm123_vm1, %v113_v15, 0.0  ;;  %v109_v21 = vld [vmem:[%s984_s1 + $0x10] sm:$0xff]  ;;  %v59_v22 = vadd.f32 %v58_v10, %v57_v4  ;;  %v110_v26 = vld [vmem:[%s984_s1 + $0x18] sm:$0xff]  ;;  %v115_v63 = vld [vmem:[%s984_s1 + $0x40] sm:$0xff] }
   0xb   :  { %v52_v23 = vadd.f32 %v51_v11, %v50_v5  ;;  %v45_v24 = vadd.f32 %v44_v12, %v43_v6  ;;  %v144_v25 = vadd.f32 %v143_v16, %v142_v13  ;;  %v72_v27 = vrot.slane %v71_v17, 4  ;;  %v116_v1 = vld [vmem:[%s984_s1 + $0x48] sm:$0xff]  ;;  %v107_v2 = vld [vmem:[%s984_s1] sm:$0xff]  ;;  %v117_v11 = vld [vmem:[%s984_s1 + $0x50] sm:$0xff]  ;;  %s625_s6 = sshll.u32 %s987_s4, 4  ;;  %s626_s6 = int_to_ptr.hbm [resolvable:$true] %s625_s6 }
   0xc   :  { %v65_v28 = vrot.slane %v64_v18, 4  ;;  %v152_v29 = vsel %vm123_vm1, %v114_v19, 0.0  ;;  %v133_v30 = vsel %vm123_vm1, %v109_v21, 0.0  ;;  %v60_v31 = vrot.slane %v59_v22, 2  ;;  %v108_v10 = vld [vmem:[%s984_s1 + $0x8] sm:$0xff]  ;;  %v118_v16 = vld [vmem:[%s984_s1 + $0x58] sm:$0xff] }
   0xd   :  { %v53_v32 = vrot.slane %v52_v23, 2  ;;  %v46_v33 = vrot.slane %v45_v24, 2  ;;  %v145_v34 = vrot.slane %v144_v25, 4  ;;  %v73_v35 = vadd.f32 %v72_v27, %v71_v17  ;;  %v39_v19 = vld [vmem:[%s983_s0 + $0x28] sm:$0xff] }
   0xe   :  { %v66_v36 = vadd.f32 %v65_v28, %v64_v18  ;;  %v153_v37 = vadd.f32 %v152_v29, %v151_v20  ;;  %v134_v38 = vsel %vm123_vm1, %v110_v26, 0.0  ;;  %v61_v39 = vadd.f32 %v60_v31, %v59_v22 }
   0xf   :  { %v54_v40 = vadd.f32 %v53_v32, %v52_v23  ;;  %v47_v41 = vadd.f32 %v46_v33, %v45_v24  ;;  %v146_v42 = vadd.f32 %v145_v34, %v144_v25  ;;  %v74_v43 = vrot.slane %v73_v35, 2  ;;  %v205_v32 = vld [vmem:[%s985_s2 + $0x8] sm:$0xff] }
  0x10   :  { %v67_v44 = vrot.slane %v66_v36, 2  ;;  %v154_v45 = vrot.slane %v153_v37, 4  ;;  %v135_v46 = vadd.f32 %v134_v38, %v133_v30  ;;  %v62_v47 = vrot.slane %v61_v39, 1 }
  0x11   :  { %v55_v48 = vrot.slane %v54_v40, 1  ;;  %v48_v49 = vrot.slane %v47_v41, 1  ;;  %v147_v50 = vrot.slane %v146_v42, 2  ;;  %v75_v51 = vadd.f32 %v74_v43, %v73_v35 }
  0x12   :  { %v68_v52 = vadd.f32 %v67_v44, %v66_v36  ;;  %v155_v53 = vadd.f32 %v154_v45, %v153_v37  ;;  %v136_v54 = vrot.slane %v135_v46, 4  ;;  %v63_v55 = vadd.f32 %v62_v47, %v61_v39  ;;  %v206_v36 = vld [vmem:[%s985_s2 + $0x10] sm:$0xff] }
  0x13   :  { %v56_v56 = vadd.f32 %v55_v48, %v54_v40  ;;  %v49_v57 = vadd.f32 %v48_v49, %v47_v41  ;;  %v148_v58 = vadd.f32 %v147_v50, %v146_v42  ;;  %v76_v59 = vrot.slane %v75_v51, 1  ;;  %v40_v48 = vld [vmem:[%s983_s0 + $0x30] sm:$0xff] }
  0x14   :  { %v69_v60 = vrot.slane %v68_v52, 1  ;;  %v156_v61 = vrot.slane %v155_v53, 2  ;;  %v137_v62 = vadd.f32 %v136_v54, %v135_v46  ;;  %v101_v3 = vmul.f32 0.125, %v63_v55 }
  0x15   :  { %v100_v4 = vmul.f32 0.125, %v56_v56  ;;  %v99_v5 = vmul.f32 0.125, %v49_v57  ;;  %v149_v6 = vrot.slane %v148_v58, 1  ;;  %v77_v7 = vadd.f32 %v76_v59, %v75_v51  ;;  %v119_v51 = vld [vmem:[%s984_s1 + $0x60] sm:$0xff] }
  0x16   :  { %v157_v8 = vadd.f32 %v156_v61, %v155_v53  ;;  %v138_v9 = vrot.slane %v137_v62, 2  ;;  %289 = vperm.xlu1 %642, %v101_v3   ;;  %v160_v13 = vsel %vm123_vm1, %v115_v63, 0.0  ;;  %v161_v14 = vsel %vm123_vm1, %v116_v1, 0.0 }
  0x17   :  { %284 = vperm.xlu0 %641, %v100_v4   ;;  %v150_v12 = vadd.f32 %v149_v6, %v148_v58  ;;  %v124_v15 = vsel %vm123_vm1, %v107_v2, 0.0  ;;  %279 = vperm.xlu2 %643, %v99_v5   ;;  %v70_v17 = vadd.f32 %v69_v60, %v68_v52  ;;  %v103_v20 = vmul.f32 0.125, %v77_v7  ;;  %v120_v52 = vld [vmem:[%s984_s1 + $0x68] sm:$0xff]  ;;  %v207_v6 = vld [vmem:[%s985_s2 + $0x18] sm:$0xff] }
  0x18   :  { %v139_v18 = vadd.f32 %v138_v9, %v137_v62  ;;  %v162_v21 = vadd.f32 %v161_v14, %v160_v13  ;;  %v125_v22 = vsel %vm123_vm1, %v108_v10, 0.0  ;;  %v169_v23 = vsel %vm123_vm1, %v117_v11, 0.0 }
  0x19   :  { %v818_v24 = vmul.f32 0.0625, %v150_v12  ;;  %v158_v25 = vrot.slane %v157_v8, 1  ;;  %v126_v26 = vadd.f32 %v125_v22, %v124_v15  ;;  %v170_v27 = vsel %vm123_vm1, %v118_v16, 0.0 }
  0x1a   :  { %v140_v28 = vrot.slane %v139_v18, 1  ;;  %v163_v29 = vrot.slane %v162_v21, 4  ;;  %v171_v30 = vadd.f32 %v170_v27, %v169_v23  ;;  %v78_v31 = vsel %vm42_vm0, %v39_v19, 0.0  ;;  %v121_v27 = vld [vmem:[%s984_s1 + $0x70] sm:$0xff] }
  0x1b   :  { %v102_v33 = vmul.f32 0.125, %v70_v17  ;;  %v127_v34 = vrot.slane %v126_v26, 4  ;;  %v79_v35 = vrot.slane %v78_v31, 4  ;;  %v159_v39 = vadd.f32 %v158_v25, %v157_v8 }
  0x1c   :  { %v164_v37 = vadd.f32 %v163_v29, %v162_v21  ;;  %v172_v38 = vrot.slane %v171_v30, 4  ;;  %v219_v42 = vsel %vm42_vm0, %v205_v32, 0.0  ;;  %v141_v43 = vadd.f32 %v140_v28, %v139_v18  ;;  %v41_v21 = vld [vmem:[%s983_s0 + $0x38] sm:$0xff] }
  0x1d   :  { %v128_v40 = vadd.f32 %v127_v34, %v126_v26  ;;  %v80_v41 = vadd.f32 %v79_v35, %v78_v31  ;;  %v226_v46 = vsel %vm42_vm0, %v206_v36, 0.0  ;;  %v220_v50 = vrot.slane %v219_v42, 4  ;;  %v122_v28 = vld [vmem:[%s984_s1 + $0x78] sm:$0xff] }
  0x1e   :  { %339 = vperm.xlu1 %642, %v818_v24   ;;  %v165_v44 = vrot.slane %v164_v37, 2  ;;  %v173_v45 = vadd.f32 %v172_v38, %v171_v30  ;;  %v227_v56 = vrot.slane %v226_v46, 4  ;;  %v840_v57 = vmul.f32 0.0625, %v159_v39 }
  0x1f   :  { %299 = vperm.xlu0 %641, %v103_v20   ;;  %294 = vperm.xlu2 %643, %v102_v33   ;;  %v129_v47 = vrot.slane %v128_v40, 2  ;;  %v81_v55 = vrot.slane %v80_v41, 2  ;;  %v197_v58 = vmul.f32 0.0625, %v141_v43  ;;  %v85_v60 = vsel %vm42_vm0, %v40_v48, 0.0 }
  0x20   :  { %v166_v49 = vadd.f32 %v165_v44, %v164_v37  ;;  %v174_v54 = vrot.slane %v173_v45, 2  ;;  %v178_v62 = vsel %vm123_vm1, %v119_v51, 0.0  ;;  %v179_v63 = vsel %vm123_vm1, %v120_v52, 0.0  ;;  %v204_v52 = vld [vmem:[%s985_s2] sm:$0xff] }
  0x21   :  { %v130_v53 = vadd.f32 %v129_v47, %v128_v40  ;;  %v221_v1 = vadd.f32 %v220_v50, %v219_v42  ;;  %v82_v3 = vadd.f32 %v81_v55, %v80_v41  ;;  %v228_v4 = vadd.f32 %v227_v56, %v226_v46 }
  0x22   :  { %v167_v59 = vrot.slane %v166_v49, 1  ;;  %v175_v2 = vadd.f32 %v174_v54, %v173_v45  ;;  %v86_v5 = vrot.slane %v85_v60, 4  ;;  %v180_v9 = vadd.f32 %v179_v63, %v178_v62 }
  0x23   :  { %v131_v61 = vrot.slane %v130_v53, 1  ;;  %v715_v10 = vmov 1   ;;  %v222_v11 = vrot.slane %v221_v1, 2  ;;  %v233_v12 = vsel %vm42_vm0, %v207_v6, 0.0 }
  0x24   :  { %v168_v7 = vadd.f32 %v167_v59, %v166_v49  ;;  %v176_v13 = vrot.slane %v175_v2, 1  ;;  %v83_v14 = vrot.slane %v82_v3, 1  ;;  %v229_v15 = vrot.slane %v228_v4, 2 }
  0x25   :  { %v132_v8 = vadd.f32 %v131_v61, %v130_v53  ;;  %v87_v16 = vadd.f32 %v86_v5, %v85_v60  ;;  %v181_v19 = vrot.slane %v180_v9, 4  ;;  %v234_v20 = vrot.slane %v233_v12, 4 }
  0x26   :  { %344 = vperm.xlu1 %642, %v840_v57   ;;  %v851_v17 = vmul.f32 0.0625, %v168_v7  ;;  %v84_v22 = vadd.f32 %v83_v14, %v82_v3  ;;  %v223_v23 = vadd.f32 %v222_v11, %v221_v1  ;;  %v230_v25 = vadd.f32 %v229_v15, %v228_v4  ;;  %v208_v3 = vld [vmem:[%s985_s2 + $0x20] sm:$0xff] }
  0x27   :  { %334 = vperm.xlu0 %641, %v197_v58   ;;  %644 = vset.pattern.permute.xlu2 %v715_v10  ;;  %v196_v18 = vmul.f32 0.0625, %v132_v8  ;;  %v88_v26 = vrot.slane %v87_v16, 2  ;;  %v177_v29 = vadd.f32 %v176_v13, %v175_v2  ;;  %v182_v30 = vadd.f32 %v181_v19, %v180_v9 }
  0x28   :  { %390 = vperm.xlu2 %644, %v197_v58   ;;  %v235_v31 = vadd.f32 %v234_v20, %v233_v12  ;;  %v92_v32 = vsel %vm42_vm0, %v41_v21, 0.0  ;;  %v187_v33 = vsel %vm123_vm1, %v121_v27, 0.0  ;;  %v188_v34 = vsel %vm123_vm1, %v122_v28, 0.0  ;;  %v209_v12 = vld [vmem:[%s985_s2 + $0x28] sm:$0xff] }
  0x29   :  { %v104_v35 = vmul.f32 0.125, %v84_v22  ;;  %v224_v36 = vrot.slane %v223_v23, 1  ;;  %v231_v37 = vrot.slane %v230_v25, 1  ;;  %v89_v38 = vadd.f32 %v88_v26, %v87_v16  ;;  %v211_v26 = vld [vmem:[%s985_s2 + $0x38] sm:$0xff] }
  0x2a   :  { %v867_v39 = vmul.f32 0.0625, %v177_v29  ;;  %v183_v40 = vrot.slane %v182_v30, 2  ;;  %v236_v41 = vrot.slane %v235_v31, 2  ;;  %v93_v42 = vrot.slane %v92_v32, 4 }
  0x2b   :  { %v189_v43 = vadd.f32 %v188_v34, %v187_v33  ;;  %v225_v44 = vadd.f32 %v224_v36, %v223_v23  ;;  %v232_v45 = vadd.f32 %v231_v37, %v230_v25  ;;  %v90_v46 = vrot.slane %v89_v38, 1 }
  0x2c   :  { %v237_v47 = vadd.f32 %v236_v41, %v235_v31  ;;  %v94_v48 = vadd.f32 %v93_v42, %v92_v32  ;;  %v212_v59 = vsel %vm42_vm0, %v204_v52, 0.0  ;;  %v240_v9 = vsel %vm42_vm0, %v208_v3, 0.0 }
  0x2d   :  { %v190_v49 = vrot.slane %v189_v43, 4  ;;  %v269_v50 = vmul.f32 0.125, %v225_v44  ;;  %v91_v51 = vadd.f32 %v90_v46, %v89_v38  ;;  %v270_v53 = vmul.f32 0.125, %v232_v45 }
  0x2e   :  { %349 = vperm.xlu1 %642, %v851_v17   ;;  %v238_v55 = vrot.slane %v237_v47, 1  ;;  %v95_v56 = vrot.slane %v94_v48, 2  ;;  %v213_v2 = vrot.slane %v212_v59, 4  ;;  %v241_v15 = vrot.slane %v240_v9, 4 }
  0x2f   :  { %329 = vperm.xlu0 %641, %v196_v18   ;;  %v191_v58 = vadd.f32 %v190_v49, %v189_v43  ;;  %v105_v60 = vmul.f32 0.125, %v91_v51  ;;  %v247_v16 = vsel %vm42_vm0, %v209_v12, 0.0  ;;  %v261_v31 = vsel %vm42_vm0, %v211_v26, 0.0 }
  0x30   :  { %394 = vperm.xlu2 %644, %v818_v24   ;;  %v184_v24 = vadd.f32 %v183_v40, %v182_v30  ;;  %v239_v62 = vadd.f32 %v238_v55, %v237_v47  ;;  %v96_v63 = vadd.f32 %v95_v56, %v94_v48  ;;  %v214_v8 = vadd.f32 %v213_v2, %v212_v59 }
  0x31   :  { %v192_v1 = vrot.slane %v191_v58, 2  ;;  %v242_v22 = vadd.f32 %v241_v15, %v240_v9  ;;  %v248_v23 = vrot.slane %v247_v16, 4  ;;  %v262_v36 = vrot.slane %v261_v31, 4 }
  0x32   :  { %v185_v54 = vrot.slane %v184_v24, 1  ;;  %v271_v5 = vmul.f32 0.125, %v239_v62  ;;  %v97_v6 = vrot.slane %v96_v63, 1  ;;  %v215_v14 = vrot.slane %v214_v8, 2 }
  0x33   :  { %v193_v7 = vadd.f32 %v192_v1, %v191_v58  ;;  %v243_v29 = vrot.slane %v242_v22, 2  ;;  %v249_v30 = vadd.f32 %v248_v23, %v247_v16  ;;  %v263_v41 = vadd.f32 %v262_v36, %v261_v31  ;;  %v922_v16 = vld [vmem:[#allocation2 + $0x2] ss:$0 sm:$0xff]  ;;  %v934_v31 = vld [vmem:[#allocation2 + $0x8] ss:$0 sm:$0xff] }
  0x34   :  { %v186_v61 = vadd.f32 %v185_v54, %v184_v24  ;;  %v98_v11 = vadd.f32 %v97_v6, %v96_v63  ;;  %v216_v21 = vadd.f32 %v215_v14, %v214_v8  ;;  %vm543_vm4 = vcmask 1043459  }
  0x35   :  { %v194_v13 = vrot.slane %v193_v7, 1  ;;  %v244_v33 = vadd.f32 %v243_v29, %v242_v22  ;;  %v264_v45 = vrot.slane %v263_v41, 2  ;;  %vm546_vm5 = vcmask 1044484  }
  0x36   :  { %354 = vperm.xlu1 %642, %v867_v39   ;;  %v202_v4 = vmul.f32 0.0625, %v186_v61  ;;  %v106_v19 = vmul.f32 0.125, %v98_v11  ;;  %v217_v28 = vrot.slane %v216_v21, 1  ;;  %v902_v61 = vld [vmem:[#allocation2 + $0x1] ss:$0 sm:$0xff]  ;;  %vm549_vm6 = vcmask 1045509  }
  0x37   :  { %304 = vperm.xlu0 %641, %v104_v35   ;;  %v195_v20 = vadd.f32 %v194_v13, %v193_v7  ;;  %v250_v35 = vrot.slane %v249_v30, 2  ;;  %v245_v37 = vrot.slane %v244_v33, 1  ;;  %vm552_vm7 = vcmask 1046534  }
  0x38   :  { %386 = vperm.xlu2 %644, %v196_v18   ;;  %v210_v18 = vld [vmem:[%s985_s2 + $0x30] sm:$0xff]  ;;  %v218_v32 = vadd.f32 %v217_v28, %v216_v21  ;;  %v524_v21 = vld [vmem:[#allocation2 + $0x80] sm:$0xff]  ;;  %vm555_vm8 = vcmask 1047559   ;;  %s716_s2 = smov [#allocation5]  }
  0x39   :  { %v254_v25 = vsel %vm42_vm0, %v210_v18, 0.0  ;;  %v203_v27 = vmul.f32 0.0625, %v195_v20  ;;  %v251_v40 = vadd.f32 %v250_v35, %v249_v30  ;;  %v246_v42 = vadd.f32 %v245_v37, %v244_v33  ;;  %v525_v20 = vld [vmem:[#allocation2 + $0x88] sm:$0xff]  ;;  %s623_s29 = sshll.u32 %s716_s2, 4  ;;  %s624_s29 = int_to_ptr.vmem [resolvable:$true] %s623_s29 }
  0x3a   :  { %558 = vmatpush.msra.mxu0 %v525_v20 }
  0x3b   :  { %v252_v44 = vrot.slane %v251_v40, 1  ;;  %v272_v46 = vmul.f32 0.125, %v246_v42 }
  0x3c   :  { %559 = vmatpush.msra.mxu0 %v524_v21  ;;  %v512_v21 = vld [vmem:[#allocation2 + $0x20] sm:$0xff] }
  0x3d   :  { %v253_v47 = vadd.f32 %v252_v44, %v251_v40  ;;  %v522_v44 = vld [vmem:[#allocation2 + $0x70] sm:$0xff] }
  0x3e   :  { %442 = vperm.xlu1 %642, %v269_v50  }
  0x3f   :  { %447 = vperm.xlu0 %641, %v270_v53   ;;  %v273_v48 = vmul.f32 0.125, %v253_v47 }
  0x40   :  { %645 = vset.pattern.permute.xlu2 %v714_v0 }
  0x41   :  { %309 = vperm.xlu2 %645, %v105_v60   ;;  %v900_v60 = vld [vmem:[#allocation2] ss:$0 sm:$0xff] }
  0x46   :  { %359 = vperm.xlu1 %642, %v202_v4  }
  0x47   :  { %452 = vperm.xlu0 %641, %v271_v5  }
  0x49   :  { %646 = vset.pattern.permute.xlu2 %v715_v10 }
  0x4a   :  { %402 = vperm.xlu2 %646, %v851_v17   ;;  %v255_v17 = vrot.slane %v254_v25, 4 }
  0x4c   :  { %v256_v34 = vadd.f32 %v255_v17, %v254_v25 }
  0x4e   :  { %314 = vperm.xlu1 %642, %v106_v19   ;;  %v257_v38 = vrot.slane %v256_v34, 2 }
  0x4f   :  { %649 = vset.pattern.permute.xlu0 %v715_v10 }
  0x50   :  { %398 = vperm.xlu0 %649, %v840_v57   ;;  %v268_v57 = vmul.f32 0.125, %v218_v32  ;;  %v258_v43 = vadd.f32 %v257_v38, %v256_v34  ;;  %v523_v38 = vld [vmem:[#allocation2 + $0x78] sm:$0xff] }
  0x51   :  { %560 = vmatpush.msra.mxu0 %v523_v38 }
  0x52   :  { %647 = vset.pattern.permute.xlu2 %v714_v0  ;;  %v259_v24 = vrot.slane %v258_v43, 1 }
  0x53   :  { %364 = vperm.xlu2 %647, %v203_v27   ;;  %561 = vmatpush.msra.mxu0 %v522_v44  ;;  %v589_v44 = vld [vmem:[#allocation2 + $0xe8] sm:$0xff] }
  0x56   :  { %648 = vset.pattern.permute.xlu1 %v715_v10  ;;  %v265_v10 = vadd.f32 %v264_v45, %v263_v41 }
  0x57   :  { %406 = vperm.xlu1 %648, %v867_v39   ;;  %v260_v39 = vadd.f32 %v259_v24, %v258_v43  ;;  %v521_v24 = vld [vmem:[#allocation2 + $0x68] sm:$0xff] }
  0x58   :  { %414 = vperm.xlu0 %649, %v203_v27   ;;  %v266_v49 = vrot.slane %v265_v10, 1  ;;  %v930_v27 = vld [vmem:[#allocation2 + $0x3] ss:$0 sm:$0xff]  ;;  %562 = vmatpush.msra.mxu0 %v521_v24 }
  0x59   :  { %v274_v50 = vmul.f32 0.125, %v260_v39 }
  0x5a   :  { %v267_v51 = vadd.f32 %v266_v49, %v265_v10 }
  0x5b   :  { %437 = vperm.xlu2 %647, %v268_v57  }
  0x5c   :  { %v275_v52 = vmul.f32 0.125, %v267_v51 }
  0x5f   :  { %410 = vperm.xlu1 %648, %v202_v4  }
  0x60   :  { %651 = vset.pattern.permute.xlu0 %v714_v0 }
  0x63   :  { %457 = vperm.xlu2 %647, %v272_v46  }
  0x67   :  { %650 = vset.pattern.permute.xlu1 %v714_v0 }
  0x68   :  { %462 = vperm.xlu1 %650, %v273_v48  }
  0x6b   :  { %467 = vperm.xlu2 %647, %v274_v50   ;;  %v520_v50 = vld [vmem:[#allocation2 + $0x60] sm:$0xff] }
  0x6c   :  { %563 = vmatpush.msra.mxu0 %v520_v50 }
  0x70   :  { %472 = vperm.xlu1 %650, %v275_v52   ;;  %v519_v52 = vld [vmem:[#allocation2 + $0x58] sm:$0xff] }
  0x71   :  { %v280_v53 = vpop.permute.xlu2 %279  ;;  %564 = vmatpush.msra.mxu0 %v519_v52  ;;  %v586_v52 = vld [vmem:[#allocation2 + $0xd0] sm:$0xff] }
  0x72   :  { %v318_v29 = vmul.f32 %v900_v60, %v280_v53 }
  0x79   :  { %v295_v54 = vpop.permute.xlu2 %294 }
  0x7a   :  { %v321_v6 = vmul.f32 %v900_v60, %v295_v54 }
  0x82   :  { %v391_v55 = vpop.permute.xlu2 %390 }
  0x83   :  { %v419_v22 = vmul.f32 %v922_v16, %v391_v55 }
  0x88   :  { %v290_v56 = vpop.permute.xlu1 %289 }
  0x89   :  { %v285_v58 = vpop.permute.xlu0 %284  ;;  %v320_v0 = vmul.f32 %v900_v60, %v290_v56  ;;  %v518_v56 = vld [vmem:[#allocation2 + $0x50] sm:$0xff] }
  0x8a   :  { %v395_v59 = vpop.permute.xlu2 %394  ;;  %v319_v18 = vmul.f32 %v900_v60, %v285_v58  ;;  %565 = vmatpush.msra.mxu0 %v518_v56 }
  0x8b   :  { %v420_v23 = vmul.f32 %v922_v16, %v395_v59  ;;  %v517_v59 = vld [vmem:[#allocation2 + $0x48] sm:$0xff] }
  0x8c   :  { %566 = vmatpush.msra.mxu0 %v517_v59  ;;  %v585_v59 = vld [vmem:[#allocation2 + $0xc8] sm:$0xff] }
  0x90   :  { %v340_v62 = vpop.permute.xlu1 %339 }
  0x91   :  { %v904_v63 = vpop.permute.xlu0 %299  ;;  %v370_v1 = vmul.f32 %v902_v61, %v340_v62 }
  0x92   :  { %v387_v2 = vpop.permute.xlu2 %386 }
  0x93   :  { %v378_v3 = vadd.f32 %v370_v1, %v320_v0  ;;  %v418_v40 = vmul.f32 %v922_v16, %v387_v2  ;;  %v516_v2 = vld [vmem:[#allocation2 + $0x40] sm:$0xff] }
  0x94   :  { %567 = vmatpush.msra.mxu0 %v516_v2  ;;  %v584_v2 = vld [vmem:[#allocation2 + $0xc0] sm:$0xff] }
  0x95   :  { %v428_v34 = vadd.f32 %v420_v23, %v378_v3 }
  0x98   :  { %v345_v4 = vpop.permute.xlu1 %344 }
  0x99   :  { %v335_v5 = vpop.permute.xlu0 %334  ;;  %v371_v7 = vmul.f32 %v902_v61, %v345_v4  ;;  %v515_v4 = vld [vmem:[#allocation2 + $0x38] sm:$0xff] }
  0x9a   :  { %v369_v19 = vmul.f32 %v902_v61, %v335_v5  ;;  %568 = vmatpush.msra.mxu0 %v515_v4 }
  0x9b   :  { %v910_v8 = vadd.f32 %v371_v7, %v321_v6  ;;  %v912_v9 = vpop.permute.xlu2 %309  ;;  %v514_v7 = vld [vmem:[#allocation2 + $0x30] sm:$0xff] }
  0x9c   :  { %v377_v25 = vadd.f32 %v369_v19, %v319_v18  ;;  %569 = vmatpush.msra.mxu0 %v514_v7  ;;  %v513_v18 = vld [vmem:[#allocation2 + $0x28] sm:$0xff]  ;;  %v582_v7 = vld [vmem:[#allocation2 + $0xb0] sm:$0xff] }
  0x9e   :  { %v427_v32 = vadd.f32 %v419_v22, %v377_v25  ;;  %570 = vmatpush.msra.mxu0 %v513_v18  ;;  %v511_v22 = vld [vmem:[#allocation2 + $0x18] sm:$0xff]  ;;  %v510_v25 = vld [vmem:[#allocation2 + $0x10] sm:$0xff] }
  0xa0   :  { %v914_v11 = vpop.permute.xlu1 %349  ;;  %571 = vmatpush.msra.mxu0 %v512_v21 }
  0xa1   :  { %v330_v12 = vpop.permute.xlu0 %329 }
  0xa2   :  { %v368_v28 = vmul.f32 %v902_v61, %v330_v12  ;;  %572 = vmatpush.msra.mxu0 %v511_v22 }
  0xa4   :  { %v916_v13 = vpop.permute.xlu2 %402  ;;  %v376_v36 = vadd.f32 %v368_v28, %v318_v29  ;;  %573 = vmatpush.msra.mxu0 %v510_v25 }
  0xa5   :  { %v422_v38 = vmul.f32 %v922_v16, %v916_v13 }
  0xa6   :  { %v426_v45 = vadd.f32 %v418_v40, %v376_v36  ;;  %v591_v36 = vld [vmem:[#allocation2 + $0xf8] sm:$0xff] }
  0xa8   :  { %v918_v14 = vpop.permute.xlu1 %354 }
  0xa9   :  { %v920_v15 = vpop.permute.xlu0 %304 }
  0xad   :  { %v928_v26 = vpop.permute.xlu2 %364 }
  0xb0   :  { %v443_v17 = vpop.permute.xlu1 %442 }
  0xb1   :  { %v448_v30 = vpop.permute.xlu0 %447  ;;  %v477_v33 = vmul.f32 %v930_v27, %v443_v17  ;;  %v593_v17 = vld [vmem:[#allocation2 + $0x108] sm:$0xff] }
  0xb2   :  { %v478_v35 = vmul.f32 %v930_v27, %v448_v30  ;;  %v322_v30 = vmul.f32 %v900_v60, %v904_v63  ;;  %v373_v63 = vmul.f32 %v902_v61, %v918_v14 }
  0xb3   :  { %v485_v57 = vadd.f32 %v477_v33, %v427_v32  ;;  %v372_v32 = vmul.f32 %v902_v61, %v914_v11  ;;  %v592_v33 = vld [vmem:[#allocation2 + $0x100] sm:$0xff]  ;;  %v323_v11 = vmul.f32 %v900_v60, %v920_v15 }
  0xb4   :  { %v486_v37 = vadd.f32 %v478_v35, %v428_v34 }
  0xb5   :  { %v495_v41 = vadd.f32 %v934_v31, %v485_v57  ;;  %v438_v43 = vpop.permute.xlu2 %437  ;;  %v324_v57 = vmul.f32 %v900_v60, %v912_v9  ;;  %v381_v24 = vadd.f32 %v373_v63, %v323_v11 }
  0xb6   :  { %v496_v42 = vadd.f32 %v934_v31, %v486_v37  ;;  %v476_v46 = vmul.f32 %v930_v27, %v438_v43  ;;  %v380_v37 = vadd.f32 %v372_v32, %v322_v30  ;;  %v580_v30 = vld [vmem:[#allocation2 + $0xa0] sm:$0xff]  ;;  %v579_v32 = vld [vmem:[#allocation2 + $0x98] sm:$0xff] }
  0xb7   :  { %v503_v47 = vmax.f32 %v495_v41, 0.0  ;;  %v590_v41 = vld [vmem:[#allocation2 + $0xf0] sm:$0xff] }
  0xb8   :  { %v484_v10 = vadd.f32 %v476_v46, %v426_v45  ;;  %v360_v39 = vpop.permute.xlu1 %359  ;;  %v504_v49 = vmax.f32 %v496_v42, 0.0  ;;  %v430_v45 = vadd.f32 %v422_v38, %v380_v37  ;;  %v588_v46 = vld [vmem:[#allocation2 + $0xe0] sm:$0xff] }
  0xb9   :  { %v453_v48 = vpop.permute.xlu0 %452  ;;  %v536_v53 = vrot.slane %v503_v47, 7  ;;  %v374_v40 = vmul.f32 %v902_v61, %v360_v39 }
  0xba   :  { %v494_v51 = vadd.f32 %v934_v31, %v484_v10  ;;  %v539_v55 = vrot.slane %v504_v49, 6  ;;  %v479_v5 = vmul.f32 %v930_v27, %v453_v48  ;;  %v587_v48 = vld [vmem:[#allocation2 + $0xd8] sm:$0xff] }
  0xbb   :  { %v382_v13 = vadd.f32 %v374_v40, %v324_v57 }
  0xbc   :  { %v502_v54 = vmax.f32 %v494_v51, 0.0 }
  0xbd   :  { %v458_v34 = vpop.permute.xlu2 %457 }
  0xbe   :  { %v538_v58 = vsel %vm537_vm2, %v536_v53, %v502_v54  ;;  %v480_v42 = vmul.f32 %v930_v27, %v458_v34  ;;  %v375_v53 = vmul.f32 %v902_v61, %v928_v26 }
  0xbf   :  { %v541_v62 = vsel %vm540_vm3, %v539_v55, %v538_v58 }
  0xc0   :  { %v943_v0 = vpop.permute.xlu1 %314  ;;  %v488_v10 = vadd.f32 %v480_v42, %v430_v45 }
  0xc1   :  { %v325_v54 = vmul.f32 %v900_v60, %v943_v0  ;;  %v583_v60 = vld [vmem:[#allocation2 + $0xb8] sm:$0xff] }
  0xc2   :  { %v399_v1 = vpop.permute.xlu0 %398  ;;  %v498_v56 = vadd.f32 %v934_v31, %v488_v10 }
  0xc3   :  { %v421_v3 = vmul.f32 %v922_v16, %v399_v1 }
  0xc5   :  { %v429_v6 = vadd.f32 %v421_v3, %v910_v8  ;;  %v594_v8 = vld [vmem:[#allocation2 + $0x110] sm:$0xff]  ;;  %v468_v47 = vpop.permute.xlu2 %467  ;;  %v383_v3 = vadd.f32 %v375_v53, %v325_v54 }
  0xc6   :  { %597 = vmatpush.msra.mxu1 %v594_v8  ;;  %v482_v51 = vmul.f32 %v930_v27, %v468_v47 }
  0xc7   :  { %v487_v12 = vadd.f32 %v479_v5, %v429_v6  ;;  %v506_v5 = vmax.f32 %v498_v56, 0.0 }
  0xc8   :  { %598 = vmatpush.msra.mxu1 %v593_v17  ;;  %v581_v17 = vld [vmem:[#allocation2 + $0xa8] sm:$0xff] }
  0xc9   :  { %v497_v19 = vadd.f32 %v934_v31, %v487_v12  ;;  %v407_v20 = vpop.permute.xlu1 %406 }
  0xca   :  { %599 = vmatpush.msra.mxu1 %v592_v33  ;;  %v423_v9 = vmul.f32 %v922_v16, %v407_v20  ;;  %v415_v50 = vpop.permute.xlu0 %414  ;;  %v657_v33 = vld [vmem:[#allocation2 + $0x90] ss:$0 sm:$0xff] }
  0xcb   :  { %v505_v23 = vmax.f32 %v497_v19, 0.0 }
  0xcc   :  { %600 = vmatpush.msra.mxu1 %v591_v36  ;;  %v431_v15 = vadd.f32 %v423_v9, %v381_v24 }
  0xcd   :  { %v542_v28 = vrot.slane %v505_v23, 5 }
  0xce   :  { %601 = vmatpush.msra.mxu1 %v590_v41 }
  0xcf   :  { %v949_v29 = vsel %vm543_vm4, %v542_v28, %v541_v62  ;;  %v425_v62 = vmul.f32 %v922_v16, %v415_v50 }
  0xd0   :  { %602 = vmatpush.msra.mxu1 %v589_v44 }
  0xd1   :  { %v411_v35 = vpop.permute.xlu1 %410  ;;  %v433_v0 = vadd.f32 %v425_v62, %v383_v3 }
  0xd2   :  { %v424_v43 = vmul.f32 %v922_v16, %v411_v35  ;;  %603 = vmatpush.msra.mxu1 %v588_v46  ;;  %v545_v16 = vrot.slane %v506_v5, 4 }
  0xd4   :  { %v432_v14 = vadd.f32 %v424_v43, %v382_v13  ;;  %604 = vmatpush.msra.mxu1 %v587_v48  ;;  %v547_v21 = vsel %vm546_vm5, %v545_v16, %v949_v29  ;;  %v658_v29 = vld [vmem:[#allocation2 + $0x118] ss:$0 sm:$0xff] }
  0xd6   :  { %v490_v58 = vadd.f32 %v482_v51, %v432_v14  ;;  %605 = vmatpush.msra.mxu1 %v586_v52 }
  0xd8   :  { %606 = vmatpush.msra.mxu1 %v585_v59  ;;  %v500_v61 = vadd.f32 %v934_v31, %v490_v58 }
  0xda   :  { %v463_v39 = vpop.permute.xlu1 %462  ;;  %607 = vmatpush.msra.mxu1 %v584_v2  ;;  %v508_v19 = vmax.f32 %v500_v61, 0.0 }
  0xdb   :  { %v481_v49 = vmul.f32 %v930_v27, %v463_v39 }
  0xdc   :  { %608 = vmatpush.msra.mxu1 %v583_v60  ;;  %v551_v25 = vrot.slane %v508_v19, 2 }
  0xdd   :  { %v489_v55 = vadd.f32 %v481_v49, %v431_v15 }
  0xde   :  { %609 = vmatpush.msra.mxu1 %v582_v7 }
  0xdf   :  { %v499_v1 = vadd.f32 %v934_v31, %v489_v55 }
  0xe0   :  { %610 = vmatpush.msra.mxu1 %v581_v17 }
  0xe1   :  { %v507_v4 = vmax.f32 %v499_v1, 0.0 }
  0xe2   :  { %v473_v26 = vpop.permute.xlu1 %472  ;;  %611 = vmatpush.msra.mxu1 %v580_v30 }
  0xe3   :  { %v483_v6 = vmul.f32 %v930_v27, %v473_v26  ;;  %v548_v12 = vrot.slane %v507_v4, 3 }
  0xe4   :  { %612 = vmatpush.msra.mxu1 %v579_v32 }
  0xe5   :  { %v491_v18 = vadd.f32 %v483_v6, %v433_v0  ;;  %v550_v23 = vsel %vm549_vm6, %v548_v12, %v547_v21 }
  0xe6   :  { %v553_v28 = vsel %vm552_vm7, %v551_v25, %v550_v23 }
  0xe7   :  { %v501_v20 = vadd.f32 %v934_v31, %v491_v18 }
  0xe9   :  { %v509_v22 = vmax.f32 %v501_v20, 0.0 }
  0xeb   :  { %v554_v27 = vrot.slane %v509_v22, 1 }
  0xed   :  { %v556_v8 = vsel %vm555_vm8, %v554_v27, %v553_v28 }
  0xee   :  { %574 = vmatmul.f32.vlgmr.msra.gmra.mxu0 %v556_v8 }
 0x16b   :  { %v575_v31 = vpop.f32.mrf.mxu0 }
 0x16c   :  { %v576_v34 = vadd.f32 %v657_v33, %v575_v31 }
 0x16e   :  { %v578_v35 = vmax.f32 %v576_v34, 0.0 }
 0x170   :  { %613 = vmatmul.f32.vlgmr.msra.gmra.mxu1 %v578_v35 }
 0x1ed   :  { %v614_v36 = vpop.f32.mrf.mxu1 }
 0x1ee   :  { %v615_v57 = vadd.f32 %v658_v29, %v614_v36 }
 0x1f0   :  { %617 = vst [vmem:[#allocation5] sm:$0xff] %v615_v57 }
 0x1f1   :  { %628 = dma.vmem_to_hbm [thread:$0]  %s624_s29, 128, %s626_s6, [#allocation4]  }
 0x1f2   :  { %709 = dma.done.wait [#allocation4], 128  }
 0x1f3   :  { %710 = vsyncadd [#allocation4], 4294967168 }
 0x1f4   :  { %633 = vsyncpa [#allocation3], 1 }
 0x1f5   :  { %634 = vsyncpa [#allocation4], 1 }

</bundles_post_ra>
